<compile_context>
chip_gen: v7x
topology: tpu7x:2x2x1
jax: 0.10.0
libtpu: 0.0.40
codegen_flags: <defaults>
</compile_context>

<pallas_src>
import math

import jax
import jax.numpy as jnp
from jax.experimental import pallas as pl
from jax.experimental.pallas import tpu as pltpu

GAMMA = 2
_TARGET_BLOCK_ELEMS = 512 * 1024       # ~2 MiB of f32 logits per grid step
_VMEM_LIMIT_BYTES = 32 * 1024 * 1024   # explicit scoped-VMEM budget (v5e/v6e/v7x safe)


def _choose_tiles(n, c, hw_p):
    """Pick (Bn, T, num_t).  hw_p >= 128.  T is a multiple of 128 and T <= hw_p."""
    t_budget = max(128, _TARGET_BLOCK_ELEMS // c)
    t = min((t_budget // 128) * 128, (hw_p // 128) * 128)
    t = max(t, 128)
    # Prefer a T that divides hw_p exactly (no ragged last tile) unless it would
    # shrink the block by more than 2x.
    if hw_p % t != 0 and hw_p % 128 == 0:
        for k in range(t // 128, 0, -1):
            cand = 128 * k
            if hw_p % cand == 0:
                if cand * 2 >= t:
                    t = cand
                break
    num_t = pl.cdiv(hw_p, t)
    # Batch-block Bn only when one tile covers the whole spatial extent and there
    # is element budget left; Bn is a divisor of n so no ragged N blocks exist.
    bn = 1
    if num_t == 1:
        bn_cap = max(1, _TARGET_BLOCK_ELEMS // (c * t))
        for d in range(min(bn_cap, n), 0, -1):
            if n % d == 0:
                bn = d
                break
    return bn, t, num_t


def _make_kernel(c, t, hw, num_tp, needs_mask):
    c_f = float(c)

    def kernel(x_ref, y_ref, ce_ref, focal_ref):
        # x_ref:  (Bn, C, T) logits (input dtype); classes on sublanes, spatial on lanes
        # y_ref:  (Bn, 1, T) integer labels
        # ce_ref / focal_ref: (1, 1, 1, 1) f32 partial sums, resident across the t axis
        p_idx = pl.program_id(1)
        t_idx = pl.program_id(2)

        @pl.when(t_idx == 0)
        def _init():
            ce_ref[...] = jnp.zeros_like(ce_ref)
            focal_ref[...] = jnp.zeros_like(focal_ref)

        x = x_ref[...].astype(jnp.float32)              # upcast after the VMEM load
        y = y_ref[...].astype(jnp.int32)

        if needs_mask:  # static: only emitted for ragged spatial extents
            col = jax.lax.broadcasted_iota(jnp.int32, (1, 1, t), 2) \
                  + (p_idx * num_tp + t_idx) * t
            valid = col < hw                             # (1, 1, T)
            # select (not multiply) BEFORE the softmax so OOB garbage never makes NaN
            x = jnp.where(valid, x, 0.0)

        # fused, numerically stable softmax along the class (sublane) axis
        m = jnp.max(x, axis=1, keepdims=True)            # (Bn, 1, T)
        s = x - m                                        # (Bn, C, T)
        e = jnp.exp(s)                                   # single exp pass
        denom = jnp.sum(e, axis=1, keepdims=True)        # (Bn, 1, T)

        # cross entropy per column: -log p[y] = log(denom) - s[y]
        cls = jax.lax.broadcasted_iota(jnp.int32, x.shape, 1)
        picked = jnp.sum(jnp.where(cls == y, s, 0.0), axis=1, keepdims=True)
        ce_cols = jnp.log(denom) - picked                # (Bn, 1, T)

        # sum_c (1 - p_c)^2 = (C - 2) + sum_c e_c^2 / denom^2   (gamma = 2)
        sumsq = jnp.sum(e * e, axis=1, keepdims=True)    # (Bn, 1, T)
        r = pl.reciprocal(denom, approx=True)            # EUP slot
        focal_cols = (c_f - 2.0) + sumsq * (r * r)       # (Bn, 1, T)

        if needs_mask:
            ce_cols = jnp.where(valid, ce_cols, 0.0)
            focal_cols = jnp.where(valid, focal_cols, 0.0)

        ce_ref[...] += jnp.sum(ce_cols)
        focal_ref[...] += jnp.sum(focal_cols)

    return kernel


def focal_loss(y_pred, y_true, gamma=GAMMA, reduction="mean"):
    """y_pred: [N, C, *spatial] logits (NCHW-style) or [M, C]. y_true: matching int."""
    assert gamma == 2, "kernel hardcodes gamma=2 (module default)"

    if y_pred.ndim > 2:
        n, c = y_pred.shape[0], y_pred.shape[1]
        hw = math.prod(y_pred.shape[2:])
        x3 = y_pred.reshape(n, c, hw)            # free reshape: NO transpose / pad / cast
        y2 = y_true.reshape(n, hw)
    else:
        # TODO(synk): for very large (M, C) inputs this transpose is an extra HBM pass;
        # a row-blocked (Tm, C) kernel variant would avoid it.
        m_, c = y_pred.shape
        n, hw = 1, m_
        x3 = jnp.transpose(y_pred).reshape(1, c, hw)
        y2 = y_true.reshape(1, hw)

    if x3.dtype.name not in ("float32", "bfloat16", "float16"):
        x3 = x3.astype(jnp.float32)
    if y2.dtype.name not in ("int32", "int16", "int8", "uint8"):
        y2 = y2.astype(jnp.int32)

    # Only pad the (tiny) HW < 128 case; everything else uses ragged blocks + masking.
    hw_p = hw
    if hw < 128:
        x3 = jnp.pad(x3, ((0, 0), (0, 0), (0, 128 - hw)))
        y2 = jnp.pad(y2, ((0, 0), (0, 128 - hw)))
        hw_p = 128
    y3 = y2.reshape(n, 1, hw_p)

    bn, t, num_t = _choose_tiles(n, c, hw_p)
    num_nb = n // bn
    # Engage v7x's second TensorCore when only one N block exists: split the hw
    # tiles into two "parallel" groups with separate partial accumulators.
    p = 2 if (num_nb == 1 and num_t >= 2 and num_t % 2 == 0) else 1
    num_tp = num_t // p
    needs_mask = (num_t * t) != hw

    kernel = _make_kernel(c, t, hw, num_tp, needs_mask)

    ce_part, focal_part = pl.pallas_call(
        kernel,
        out_shape=(jax.ShapeDtypeStruct((num_nb, p, 1, 1), jnp.float32),
                   jax.ShapeDtypeStruct((num_nb, p, 1, 1), jnp.float32)),
        grid_spec=pltpu.PrefetchScalarGridSpec(
            num_scalar_prefetch=0,
            grid=(num_nb, p, num_tp),
            in_specs=[
                pl.BlockSpec((bn, c, t), lambda i, pp, tt: (i, 0, pp * num_tp + tt)),
                pl.BlockSpec((bn, 1, t), lambda i, pp, tt: (i, 0, pp * num_tp + tt)),
            ],
            out_specs=(
                pl.BlockSpec((1, 1, 1, 1), lambda i, pp, tt: (i, pp, 0, 0)),
                pl.BlockSpec((1, 1, 1, 1), lambda i, pp, tt: (i, pp, 0, 0)),
            ),
        ),
        compiler_params=pltpu.CompilerParams(
            dimension_semantics=("parallel", "parallel", "arbitrary"),
            vmem_limit_bytes=_VMEM_LIMIT_BYTES),
    )(x3, y3)

    m_rows = n * hw                                  # valid pixel-rows (N*H*W)
    ce = jnp.sum(ce_part) / m_rows                   # NLLLoss(reduction='mean')
    focal_sum = jnp.sum(focal_part)

    if reduction == "mean":
        return ce * (focal_sum / (m_rows * c))
    elif reduction == "sum":
        return ce * focal_sum
    else:
        # TODO(synk): reduction='none' needs the full (M, C) focal map as an output.
        raise NotImplementedError("reduction='none' is not supported by this kernel")


def _reference(y_pred, y_true, gamma=GAMMA):
    c = y_pred.shape[1]
    perm = (0,) + tuple(range(2, y_pred.ndim)) + (1,)
    x2d = jnp.transpose(y_pred, perm).reshape(-1, c).astype(jnp.float32)
    y = y_true.reshape(-1)
    logp = jax.nn.log_softmax(x2d, axis=-1)
    p = jnp.exp(logp)
    ce = -jnp.mean(logp[jnp.arange(x2d.shape[0]), y])
    return jnp.mean((1.0 - p) ** gamma * ce)


if __name__ == "__main__":
    key = jax.random.PRNGKey(0)

    def run_case(k, n, c, spatial, dtype=jnp.float32):
        k1, k2 = jax.random.split(k)
        y_pred = jax.random.normal(k1, (n, c) + spatial, dtype=jnp.float32).astype(dtype)
        y_true = jax.random.randint(k2, (n,) + spatial, 0, c, dtype=jnp.int32)
        loss = jax.block_until_ready(focal_loss(y_pred, y_true))
        ref = _reference(y_pred, y_true)
        assert jnp.allclose(loss, ref, rtol=2e-3, atol=1e-5), \
            (n, c, spatial, str(dtype), float(loss), float(ref))

    keys = jax.random.split(key, 6)
    run_case(keys[0], 2, 4, (16, 16))                        # spec shape: one step, Bn=2
    run_case(keys[1], 1, 3, (5, 7))                          # tiny ragged HW (<128) + mask
    run_case(keys[2], 3, 4, (48, 48))                        # odd batch block Bn=3
    run_case(keys[3], 1, 64, (160, 160))                     # multi-tile grid (1,2,2)
    run_case(keys[4], 1, 64, (100, 100))                     # ragged multi-tile masking
    run_case(keys[5], 2, 4, (32, 32), dtype=jnp.bfloat16)    # bf16 streamed, upcast in-kernel

    print("KERNEL_OK")
</pallas_src>

<mosaic_0001>
module attributes {stable_mosaic.version = 11 : i64} {
  func.func @kernel(%arg0: i32, %arg1: i32, %arg2: i32, %arg3: memref<2x4x256xf32, #tpu.memory_space<vmem>>, %arg4: memref<2x1x256xi32, #tpu.memory_space<vmem>>, %arg5: memref<1x1x1x1xf32, #tpu.memory_space<vmem>>, %arg6: memref<1x1x1x1xf32, #tpu.memory_space<vmem>>) attributes {dimension_semantics = [#tpu.dimension_semantics<parallel>, #tpu.dimension_semantics<parallel>, #tpu.dimension_semantics<arbitrary>], iteration_bounds = array<i64: 1, 1, 1>, scalar_prefetch = 0 : i64, scratch_operands = 0 : i64, tpu.core_type = #tpu.core_type<tc>, window_params = [{transform_indices = @transform_0, window_bounds = array<i64: 2, 4, 256>}, {transform_indices = @transform_1, window_bounds = array<i64: 2, 1, 256>}, {transform_indices = @transform_2, window_bounds = array<i64: 1, 1, 1, 1>}, {transform_indices = @transform_3, window_bounds = array<i64: 1, 1, 1, 1>}]} {
    %c0_i32 = arith.constant 0 : i32
    %0 = arith.cmpi eq, %arg2, %c0_i32 : i32
    %1 = arith.extui %0 : i1 to i32
    %c0_i32_0 = arith.constant 0 : i32
    %2 = arith.cmpi ne, %1, %c0_i32_0 : i32
    scf.if %2 {
      %cst_29 = arith.constant 0.000000e+00 : f32
      %45 = vector.broadcast %cst_29 : f32 to vector<1x1x1x1xf32>
      %c0_30 = arith.constant 0 : index
      %c0_31 = arith.constant 0 : index
      %c0_32 = arith.constant 0 : index
      %c0_33 = arith.constant 0 : index
      %46 = vector.load %arg5[%c0_30, %c0_31, %c0_32, %c0_33] : memref<1x1x1x1xf32, #tpu.memory_space<vmem>>, vector<1x1x1x1xf32>
      tpu.vector_store %arg5[%c0_30, %c0_31, %c0_32, %c0_33], %45 {strides = array<i32>} : memref<1x1x1x1xf32, #tpu.memory_space<vmem>>, vector<1x1x1x1xf32>,
      %cst_34 = arith.constant 0.000000e+00 : f32
      %47 = vector.broadcast %cst_34 : f32 to vector<1x1x1x1xf32>
      %c0_35 = arith.constant 0 : index
      %c0_36 = arith.constant 0 : index
      %c0_37 = arith.constant 0 : index
      %c0_38 = arith.constant 0 : index
      %48 = vector.load %arg6[%c0_35, %c0_36, %c0_37, %c0_38] : memref<1x1x1x1xf32, #tpu.memory_space<vmem>>, vector<1x1x1x1xf32>
      tpu.vector_store %arg6[%c0_35, %c0_36, %c0_37, %c0_38], %47 {strides = array<i32>} : memref<1x1x1x1xf32, #tpu.memory_space<vmem>>, vector<1x1x1x1xf32>,
    } else {
    }
    %c0 = arith.constant 0 : index
    %c0_1 = arith.constant 0 : index
    %c0_2 = arith.constant 0 : index
    %3 = vector.load %arg3[%c0, %c0_1, %c0_2] : memref<2x4x256xf32, #tpu.memory_space<vmem>>, vector<2x4x256xf32>
    %c0_3 = arith.constant 0 : index
    %c0_4 = arith.constant 0 : index
    %c0_5 = arith.constant 0 : index
    %4 = vector.load %arg4[%c0_3, %c0_4, %c0_5] : memref<2x1x256xi32, #tpu.memory_space<vmem>>, vector<2x1x256xi32>
    %cst = arith.constant dense<0xFF800000> : vector<2x256xf32>
    %5 = vector.multi_reduction <maximumf>, %3, %cst [1] : vector<2x4x256xf32> to vector<2x256xf32>
    %6 = vector.shape_cast %5 : vector<2x256xf32> to vector<2x1x256xf32>
    %7 = vector.broadcast %6 : vector<2x1x256xf32> to vector<2x4x256xf32>
    %8 = arith.subf %3, %7 : vector<2x4x256xf32>
    %9 = math.exp %8 : vector<2x4x256xf32>
    %cst_6 = arith.constant dense<0.000000e+00> : vector<2x256xf32>
    %10 = vector.multi_reduction <add>, %9, %cst_6 [1] : vector<2x4x256xf32> to vector<2x256xf32>
    %11 = vector.shape_cast %10 : vector<2x256xf32> to vector<2x1x256xf32>
    %12 = tpu.iota {dimensions = array<i32: 1>} : vector<2x4x256xi32>
    %13 = vector.broadcast %4 : vector<2x1x256xi32> to vector<2x4x256xi32>
    %14 = arith.cmpi eq, %12, %13 : vector<2x4x256xi32>
    %cst_7 = arith.constant 0.000000e+00 : f32
    %15 = vector.broadcast %cst_7 : f32 to vector<2x4x256xf32>
    %16 = arith.select %14, %8, %15 : vector<2x4x256xi1>, vector<2x4x256xf32>
    %cst_8 = arith.constant dense<0.000000e+00> : vector<2x256xf32>
    %17 = vector.multi_reduction <add>, %16, %cst_8 [1] : vector<2x4x256xf32> to vector<2x256xf32>
    %18 = vector.shape_cast %17 : vector<2x256xf32> to vector<2x1x256xf32>
    %19 = math.log %11 : vector<2x1x256xf32>
    %20 = arith.subf %19, %18 : vector<2x1x256xf32>
    %21 = arith.mulf %9, %9 : vector<2x4x256xf32>
    %cst_9 = arith.constant dense<0.000000e+00> : vector<2x256xf32>
    %22 = vector.multi_reduction <add>, %21, %cst_9 [1] : vector<2x4x256xf32> to vector<2x256xf32>
    %23 = vector.shape_cast %22 : vector<2x256xf32> to vector<2x1x256xf32>
    %24 = tpu.reciprocal %11 {approx = true} : vector<2x1x256xf32> -> vector<2x1x256xf32>
    %25 = arith.mulf %24, %24 : vector<2x1x256xf32>
    %26 = arith.mulf %23, %25 : vector<2x1x256xf32>
    %cst_10 = arith.constant 2.000000e+00 : f32
    %27 = vector.broadcast %cst_10 : f32 to vector<2x1x256xf32>
    %28 = arith.addf %27, %26 : vector<2x1x256xf32>
    %c0_11 = arith.constant 0 : index
    %c0_12 = arith.constant 0 : index
    %c0_13 = arith.constant 0 : index
    %c0_14 = arith.constant 0 : index
    %29 = vector.load %arg5[%c0_11, %c0_12, %c0_13, %c0_14] : memref<1x1x1x1xf32, #tpu.memory_space<vmem>>, vector<1x1x1x1xf32>
    %30 = vector.shape_cast %20 : vector<2x1x256xf32> to vector<1x2x1x256xf32>
    %cst_15 = arith.constant dense<0.000000e+00> : vector<1xf32>
    %31 = vector.multi_reduction <add>, %30, %cst_15 [1, 2, 3] : vector<1x2x1x256xf32> to vector<1xf32>
    %32 = vector.shape_cast %31 : vector<1xf32> to vector<1x1x1x1xf32>
    %33 = vector.extract %32[0, 0, 0, 0] : f32 from vector<1x1x1x1xf32>
    %34 = vector.broadcast %33 : f32 to vector<1x1x1x1xf32>
    %35 = arith.addf %29, %34 : vector<1x1x1x1xf32>
    %c0_16 = arith.constant 0 : index
    %c0_17 = arith.constant 0 : index
    %c0_18 = arith.constant 0 : index
    %c0_19 = arith.constant 0 : index
    %36 = vector.load %arg5[%c0_16, %c0_17, %c0_18, %c0_19] : memref<1x1x1x1xf32, #tpu.memory_space<vmem>>, vector<1x1x1x1xf32>
    tpu.vector_store %arg5[%c0_16, %c0_17, %c0_18, %c0_19], %35 {strides = array<i32>} : memref<1x1x1x1xf32, #tpu.memory_space<vmem>>, vector<1x1x1x1xf32>,
    %c0_20 = arith.constant 0 : index
    %c0_21 = arith.constant 0 : index
    %c0_22 = arith.constant 0 : index
    %c0_23 = arith.constant 0 : index
    %37 = vector.load %arg6[%c0_20, %c0_21, %c0_22, %c0_23] : memref<1x1x1x1xf32, #tpu.memory_space<vmem>>, vector<1x1x1x1xf32>
    %38 = vector.shape_cast %28 : vector<2x1x256xf32> to vector<1x2x1x256xf32>
    %cst_24 = arith.constant dense<0.000000e+00> : vector<1xf32>
    %39 = vector.multi_reduction <add>, %38, %cst_24 [1, 2, 3] : vector<1x2x1x256xf32> to vector<1xf32>
    %40 = vector.shape_cast %39 : vector<1xf32> to vector<1x1x1x1xf32>
    %41 = vector.extract %40[0, 0, 0, 0] : f32 from vector<1x1x1x1xf32>
    %42 = vector.broadcast %41 : f32 to vector<1x1x1x1xf32>
    %43 = arith.addf %37, %42 : vector<1x1x1x1xf32>
    %c0_25 = arith.constant 0 : index
    %c0_26 = arith.constant 0 : index
    %c0_27 = arith.constant 0 : index
    %c0_28 = arith.constant 0 : index
    %44 = vector.load %arg6[%c0_25, %c0_26, %c0_27, %c0_28] : memref<1x1x1x1xf32, #tpu.memory_space<vmem>>, vector<1x1x1x1xf32>
    tpu.vector_store %arg6[%c0_25, %c0_26, %c0_27, %c0_28], %43 {strides = array<i32>} : memref<1x1x1x1xf32, #tpu.memory_space<vmem>>, vector<1x1x1x1xf32>,
    return
  }
  func.func @transform_0(%arg0: i32, %arg1: i32, %arg2: i32) -> (i32, i32, i32) {
    %c1_i32 = arith.constant 1 : i32
    %0 = arith.muli %arg1, %c1_i32 : i32
    %1 = arith.addi %0, %arg2 : i32
    %c0_i32 = arith.constant 0 : i32
    %c0_i32_0 = arith.constant 0 : i32
    return %arg0, %c0_i32, %1 : i32, i32, i32
  }
  func.func @transform_1(%arg0: i32, %arg1: i32, %arg2: i32) -> (i32, i32, i32) {
    %c1_i32 = arith.constant 1 : i32
    %0 = arith.muli %arg1, %c1_i32 : i32
    %1 = arith.addi %0, %arg2 : i32
    %c0_i32 = arith.constant 0 : i32
    %c0_i32_0 = arith.constant 0 : i32
    return %arg0, %c0_i32, %1 : i32, i32, i32
  }
  func.func @transform_2(%arg0: i32, %arg1: i32, %arg2: i32) -> (i32, i32, i32, i32) {
    %c0_i32 = arith.constant 0 : i32
    %c0_i32_0 = arith.constant 0 : i32
    %c0_i32_1 = arith.constant 0 : i32
    return %arg0, %arg1, %c0_i32, %c0_i32_0 : i32, i32, i32, i32
  }
  func.func @transform_3(%arg0: i32, %arg1: i32, %arg2: i32) -> (i32, i32, i32, i32) {
    %c0_i32 = arith.constant 0 : i32
    %c0_i32_0 = arith.constant 0 : i32
    %c0_i32_1 = arith.constant 0 : i32
    return %arg0, %arg1, %c0_i32, %c0_i32_0 : i32, i32, i32, i32
  }
}

</mosaic_0001>

<bundles_post_ra>
// kernel: tpu_custom_call.1
= control target key start
LH: loop header
LB: loop body
LE: loop exit
PB: predicated region body
PF: predicated region fallthrough
CT: control target
= control target key end

     0   :  { %9 = vsyncpa [#allocation3], 0  ;;  %s581_s0 = inlined_call_operand.hbm [shape: f32[2,4,256], index: 0, kind: input, shape index: {}]   ;;  %s582_s1 = inlined_call_operand.hbm [shape: s32[2,1,256], index: 1, kind: input, shape index: {}]   ;;  %s583_s2 = inlined_call_operand.hbm [shape: f32[1,1,1,1], index: 2, kind: output, shape index: {0}]   ;;  %s584_s3 = inlined_call_operand.hbm [shape: f32[1,1,1,1], index: 3, kind: output, shape index: {1}]  }
   0x1   :  { %10 = vsyncpa [#allocation6], 0 }
   0x2   :  { %11 = vsyncpa [#allocation4], 0 }
   0x3   :  { %12 = vsyncpa [#allocation9], 0  ;;  %s476_s12 = smov [#allocation2]   ;;  %s380_s16 = scalar_lea.hbm %s581_s0, 256 }
   0x4   :  { %s22_s13 = sshll.u32 %s476_s12, 4  ;;  %p381_p0 = scmp.ne.s32.totalorder %s581_s0, %s380_s16  ;;  %s23_s13 = int_to_ptr.vmem [resolvable:$true] %s22_s13 }
   0x5   :  { %p384_p1 = scmp.lt.u32.totalorder %s380_s16, %s581_s0 }
   0x7   :  { %p386_p2 = pnand %p384_p1, %p381_p0 }
   0x9   :  { %389 = shalt.err (!%p386_p2)
}
   0xa   :  { %s390_s21 = scalar_lea.vmem %s23_s13, 256  ;;  %p395_p4 = scmp.lt.s32.totalorder %s23_s13, %s23_s13 }
   0xb   :  { %p391_p3 = scmp.ne.s32.totalorder %s23_s13, %s390_s21  ;;  %p396_p5 = scmp.lt.s32.totalorder %s390_s21, %s390_s21 }
   0xd   :  { %p397_p6 = por %p396_p5, %p395_p4 }
   0xf   :  { %p398_p7 = pnand %p397_p6, %p391_p3 }
  0x11   :  { %401 = shalt.err (!%p398_p7)
}
  0x12   :  { %s477_s22 = smov 128   ;;  %s478_s23 = smov 8  }
  0x13   :  { %28 = dma.hbm_to_vmem [thread:$0]  %s581_s0, 256, %s23_s13, [#allocation3], %s477_s22, %s477_s22, %s478_s23  }
  0x14   :  { %s479_s26 = smov [#allocation5]   ;;  %s402_s30 = scalar_lea.hbm %s582_s1, 64 }
  0x15   :  { %s38_s27 = sshll.u32 %s479_s26, 4  ;;  %p403_p8 = scmp.ne.s32.totalorder %s582_s1, %s402_s30  ;;  %s39_s27 = int_to_ptr.vmem [resolvable:$true] %s38_s27 }
  0x16   :  { %p406_p9 = scmp.lt.u32.totalorder %s402_s30, %s582_s1 }
  0x18   :  { %p408_p10 = pnand %p406_p9, %p403_p8 }
  0x1a   :  { %411 = shalt.err (!%p408_p10)
}
  0x1b   :  { %s412_s8 = scalar_lea.vmem %s39_s27, 64  ;;  %p417_p12 = scmp.lt.s32.totalorder %s39_s27, %s39_s27 }
  0x1c   :  { %p413_p11 = scmp.ne.s32.totalorder %s39_s27, %s412_s8  ;;  %p418_p13 = scmp.lt.s32.totalorder %s412_s8, %s412_s8 }
  0x1e   :  { %p419_p0 = por %p418_p13, %p417_p12 }
  0x20   :  { %p420_p1 = pnand %p419_p0, %p413_p11 }
  0x22   :  { %423 = shalt.err (!%p420_p1)
}
  0x23   :  { %s480_s0 = smov 32   ;;  %s481_s9 = smov 2  }
  0x24   :  { %44 = dma.hbm_to_vmem [thread:$0]  %s582_s1, 64, %s39_s27, [#allocation6], %s480_s0, %s480_s0, %s481_s9  }
  0x25   :  { %468 = dma.done.wait [#allocation3], 256  }
  0x26   :  { %469 = vsyncadd [#allocation3], 4294967040 }
  0x27   :  { %470 = dma.done.wait [#allocation6], 64  }
  0x28   :  { %471 = vsyncadd [#allocation6], 4294967232  ;;  %vm72_vm0 = vcmask 1043456   ;;  %v62_v0 = vld [vmem:[#allocation2] sm:$0xff]  ;;  %v63_v1 = vld [vmem:[#allocation2 + $0x8] sm:$0xff]  ;;  %v149_v10 = vlaneseq  ;;  %vm274_vm5 = vcmask 1040384  }
  0x29   :  { %v68_v2 = vcombine.high %v62_v0, %v62_v0  ;;  %v69_v3 = vcombine.high %v63_v1, %v63_v1  ;;  %v73_v4 = vsel %vm72_vm0, %v62_v0, -inf  ;;  %v87_v5 = vsel %vm72_vm0, %v63_v1, -inf  ;;  %v64_v33 = vld [vmem:[#allocation5] sm:$0x3]  ;;  %v65_v37 = vld [vmem:[#allocation5 + $0x2] sm:$0x3] }
  0x2a   :  { %v74_v6 = vrot.slane %v73_v4, 4  ;;  %v88_v7 = vrot.slane %v87_v5, 4  ;;  %v150_v19 = vshrl.u32 %v149_v10, 7  ;;  %vm59_vm6 = vcmask 0   ;;  %s483_s12 = smov [#allocation7]   ;;  %s484_s14 = smov [#allocation8]  }
  0x2b   :  { %v80_v8 = vsel %vm72_vm0, %v68_v2, -inf  ;;  %v94_v9 = vsel %vm72_vm0, %v69_v3, -inf  ;;  %s321_s13 = sshll.u32 %s483_s12, 4  ;;  %s331_s15 = sshll.u32 %s484_s14, 4  ;;  %s322_s13 = int_to_ptr.vmem [resolvable:$true] %s321_s13  ;;  %s332_s15 = int_to_ptr.vmem [resolvable:$true] %s331_s15 }
  0x2c   :  { %v75_v11 = vmax.f32 %v73_v4, %v74_v6  ;;  %v81_v12 = vrot.slane %v80_v8, 4  ;;  %v89_v13 = vmax.f32 %v87_v5, %v88_v7  ;;  %v95_v14 = vrot.slane %v94_v9, 4  ;;  %s424_s17 = scalar_lea.vmem %s322_s13, 16  ;;  %s428_s18 = scalar_lea.vmem %s322_s13, 32 }
  0x2d   :  { %v153_v28 = vsub.s32 0, %v150_v19  ;;  %v157_v36 = vsub.s32 1, %v150_v19  ;;  %p425_p2 = scmp.ne.s32.totalorder %s322_s13, %s424_s17  ;;  %p429_p3 = scmp.lt.s32.totalorder %s322_s13, %s322_s13 }
  0x2e   :  { %v76_v15 = vrot.slane %v75_v11, 2  ;;  %v82_v16 = vmax.f32 %v80_v8, %v81_v12  ;;  %v90_v17 = vrot.slane %v89_v13, 2  ;;  %v96_v18 = vmax.f32 %v94_v9, %v95_v14  ;;  %p430_p4 = scmp.lt.s32.totalorder %s428_s18, %s424_s17 }
  0x2f   :  { %v154_v40 = vrot.slane %v64_v33, %v153_v28  ;;  %v158_v43 = vrot.slane %v64_v33, %v157_v36  ;;  %v162_v44 = vrot.slane %v65_v37, %v153_v28  ;;  %v166_v47 = vrot.slane %v65_v37, %v157_v36 }
  0x30   :  { %v77_v20 = vmax.f32 %v75_v11, %v76_v15  ;;  %v83_v21 = vrot.slane %v82_v16, 2  ;;  %v91_v22 = vmax.f32 %v89_v13, %v90_v17  ;;  %v97_v23 = vrot.slane %v96_v18, 2  ;;  %p431_p5 = por %p430_p4, %p429_p3 }
  0x31   :  { %vm167_vm1 = vcmp.eq.s32.totalorder %v150_v19, %v154_v40  ;;  %vm168_vm2 = vcmp.eq.s32.totalorder %v150_v19, %v158_v43  ;;  %vm169_vm3 = vcmp.eq.s32.totalorder %v150_v19, %v162_v44  ;;  %vm170_vm4 = vcmp.eq.s32.totalorder %v150_v19, %v166_v47 }
  0x32   :  { %v78_v24 = vrot.slane %v77_v20, 1  ;;  %v84_v25 = vmax.f32 %v82_v16, %v83_v21  ;;  %v92_v26 = vrot.slane %v91_v22, 1  ;;  %v98_v27 = vmax.f32 %v96_v18, %v97_v23  ;;  %p432_p6 = pnand %p431_p5, %p425_p2 }
  0x34   :  { %v79_v29 = vmax.f32 %v77_v20, %v78_v24  ;;  %v85_v30 = vrot.slane %v84_v25, 1  ;;  %v93_v31 = vmax.f32 %v91_v22, %v92_v26  ;;  %v99_v32 = vrot.slane %v98_v27, 1 }
  0x36   :  { %v86_v34 = vmax.f32 %v84_v25, %v85_v30  ;;  %v100_v35 = vmax.f32 %v98_v27, %v99_v32 }
  0x38   :  { %v105_v38 = vcombine.low %v79_v29, %v86_v34  ;;  %v106_v39 = vcombine.low %v93_v31, %v100_v35 }
  0x3a   :  { %v109_v41 = vsub.f32 %v62_v0, %v105_v38  ;;  %v110_v42 = vsub.f32 %v63_v1, %v106_v39 }
  0x3c   :  { %v111_v45 = vmul.f32 1.442695, %v109_v41  ;;  %v113_v46 = vmul.f32 1.442695, %v110_v42  ;;  %v173_v48 = vcombine.high %v109_v41, %v109_v41  ;;  %v177_v49 = vsel %vm167_vm1, %v109_v41, 0.0 }
  0x3d   :  { %v174_v50 = vcombine.high %v110_v42, %v110_v42  ;;  %v179_v52 = vsel %vm169_vm3, %v110_v42, 0.0  ;;  %v181_v53 = vsel %vm72_vm0, %v177_v49, 0.0 }
  0x3e   :  { %360 = vpow2.f32 %v111_v45  ;;  %v178_v51 = vsel %vm168_vm2, %v173_v48, 0.0  ;;  %v195_v56 = vsel %vm72_vm0, %v179_v52, 0.0  ;;  %v182_v57 = vrot.slane %v181_v53, 4 }
  0x3f   :  { %362 = vpow2.f32 %v113_v46  ;;  %v180_v54 = vsel %vm170_vm4, %v174_v50, 0.0  ;;  %v188_v55 = vsel %vm72_vm0, %v178_v51, 0.0  ;;  %v196_v59 = vrot.slane %v195_v56, 4 }
  0x40   :  { %v189_v58 = vrot.slane %v188_v55, 4  ;;  %v202_v60 = vsel %vm72_vm0, %v180_v54, 0.0  ;;  %v183_v1 = vadd.f32 %v182_v57, %v181_v53 }
  0x41   :  { %v203_v5 = vrot.slane %v202_v60, 4  ;;  %v197_v9 = vadd.f32 %v196_v59, %v195_v56 }
  0x42   :  { %v190_v8 = vadd.f32 %v189_v58, %v188_v55  ;;  %v184_v16 = vrot.slane %v183_v1, 2 }
  0x43   :  { %v204_v32 = vadd.f32 %v203_v5, %v202_v60  ;;  %v198_v40 = vrot.slane %v197_v9, 2 }
  0x44   :  { %v191_v48 = vrot.slane %v190_v8, 2  ;;  %v185_v54 = vadd.f32 %v184_v16, %v183_v1 }
  0x45   :  { %v205_v51 = vrot.slane %v204_v32, 2  ;;  %v199_v56 = vadd.f32 %v198_v40, %v197_v9 }
  0x46   :  { %v192_v58 = vadd.f32 %v191_v48, %v190_v8 }
  0x47   :  { %v206_v60 = vadd.f32 %v205_v51, %v204_v32 }
  0x48   :  { %v361_v61 = vpop.eup %360 }
  0x49   :  { %v363_v62 = vpop.eup %362  ;;  %v117_v63 = vcombine.high %v361_v61, %v361_v61  ;;  %v121_v0 = vsel %vm72_vm0, %v361_v61, 0.0  ;;  %v221_v13 = vmul.f32 %v361_v61, %v361_v61  ;;  %v207_v1 = vrot.slane %v206_v60, 1 }
  0x4a   :  { %v118_v2 = vcombine.high %v363_v62, %v363_v62  ;;  %v122_v3 = vrot.slane %v121_v0, 4  ;;  %v135_v4 = vsel %vm72_vm0, %v363_v62, 0.0  ;;  %v222_v17 = vmul.f32 %v363_v62, %v363_v62 }
  0x4b   :  { %v128_v6 = vsel %vm72_vm0, %v117_v63, 0.0  ;;  %v136_v7 = vrot.slane %v135_v4, 4  ;;  %v225_v20 = vcombine.high %v221_v13, %v221_v13  ;;  %v229_v21 = vsel %vm72_vm0, %v221_v13, 0.0 }
  0x4c   :  { %v123_v10 = vadd.f32 %v122_v3, %v121_v0  ;;  %v129_v11 = vrot.slane %v128_v6, 4  ;;  %v142_v12 = vsel %vm72_vm0, %v118_v2, 0.0  ;;  %v226_v24 = vcombine.high %v222_v17, %v222_v17 }
  0x4d   :  { %v137_v14 = vadd.f32 %v136_v7, %v135_v4  ;;  %v143_v15 = vrot.slane %v142_v12, 4  ;;  %v230_v25 = vrot.slane %v229_v21, 4  ;;  %v236_v28 = vsel %vm72_vm0, %v225_v20, 0.0 }
  0x4e   :  { %v124_v18 = vrot.slane %v123_v10, 2  ;;  %v130_v19 = vadd.f32 %v129_v11, %v128_v6  ;;  %v243_v29 = vsel %vm72_vm0, %v222_v17, 0.0  ;;  %v237_v33 = vrot.slane %v236_v28, 4 }
  0x4f   :  { %v138_v22 = vrot.slane %v137_v14, 2  ;;  %v144_v23 = vadd.f32 %v143_v15, %v142_v12  ;;  %v244_v36 = vrot.slane %v243_v29, 4  ;;  %v250_v37 = vsel %vm72_vm0, %v226_v24, 0.0 }
  0x50   :  { %v125_v26 = vadd.f32 %v124_v18, %v123_v10  ;;  %v131_v27 = vrot.slane %v130_v19, 2  ;;  %v231_v41 = vadd.f32 %v230_v25, %v229_v21  ;;  %v238_v44 = vadd.f32 %v237_v33, %v236_v28 }
  0x51   :  { %v139_v30 = vadd.f32 %v138_v22, %v137_v14  ;;  %v145_v31 = vrot.slane %v144_v23, 2  ;;  %v251_v45 = vrot.slane %v250_v37, 4  ;;  %v245_v49 = vadd.f32 %v244_v36, %v243_v29 }
  0x52   :  { %v126_v34 = vrot.slane %v125_v26, 1  ;;  %v132_v35 = vadd.f32 %v131_v27, %v130_v19  ;;  %v232_v55 = vrot.slane %v231_v41, 2  ;;  %v239_v57 = vrot.slane %v238_v44, 2 }
  0x53   :  { %v140_v38 = vrot.slane %v139_v30, 1  ;;  %v146_v39 = vadd.f32 %v145_v31, %v144_v23  ;;  %v252_v52 = vadd.f32 %v251_v45, %v250_v37  ;;  %v246_v59 = vrot.slane %v245_v49, 2 }
  0x54   :  { %v127_v42 = vadd.f32 %v126_v34, %v125_v26  ;;  %v133_v43 = vrot.slane %v132_v35, 1  ;;  %v186_v62 = vrot.slane %v185_v54, 1  ;;  %v233_v63 = vadd.f32 %v232_v55, %v231_v41 }
  0x55   :  { %v141_v46 = vadd.f32 %v140_v38, %v139_v30  ;;  %v147_v47 = vrot.slane %v146_v39, 1  ;;  %v253_v61 = vrot.slane %v252_v52, 2  ;;  %v200_v0 = vrot.slane %v199_v56, 1 }
  0x56   :  { %v134_v50 = vadd.f32 %v133_v43, %v132_v35  ;;  %364 = vlog2.f32 %v127_v42  ;;  %v240_v2 = vadd.f32 %v239_v57, %v238_v44  ;;  %v193_v3 = vrot.slane %v192_v58, 1 }
  0x57   :  { %v148_v53 = vadd.f32 %v147_v47, %v146_v39  ;;  %366 = vlog2.f32 %v141_v46  ;;  %v247_v4 = vadd.f32 %v246_v59, %v245_v49  ;;  %v254_v5 = vadd.f32 %v253_v61, %v252_v52 }
  0x58   :  { %368 = vlog2.f32 %v134_v50  ;;  %v187_v6 = vadd.f32 %v186_v62, %v185_v54  ;;  %v234_v7 = vrot.slane %v233_v63, 1  ;;  %v201_v8 = vadd.f32 %v200_v0, %v199_v56 }
  0x59   :  { %370 = vlog2.f32 %v148_v53  ;;  %v241_v10 = vrot.slane %v240_v2, 1  ;;  %v194_v12 = vadd.f32 %v193_v3, %v192_v58  ;;  %v248_v14 = vrot.slane %v247_v4, 1 }
  0x5a   :  { %372 = vrcp.f32 %v127_v42  ;;  %v208_v16 = vadd.f32 %v207_v1, %v206_v60  ;;  %v255_v18 = vrot.slane %v254_v5, 1  ;;  %v235_v22 = vadd.f32 %v234_v7, %v233_v63 }
  0x5b   :  { %374 = vrcp.f32 %v134_v50  ;;  %v242_v26 = vadd.f32 %v241_v10, %v240_v2  ;;  %v249_v30 = vadd.f32 %v248_v14, %v247_v4  ;;  %v482_v60 = vmov 0.0  }
  0x5c   :  { %376 = vrcp.f32 %v141_v46  ;;  %v256_v34 = vadd.f32 %v255_v18, %v254_v5  ;;  %60 = vst.msk [vmem:[#allocation7] sm:$0x1] %vm59_vm6, %v482_v60  ;;  %61 = vst.msk [vmem:[#allocation8] sm:$0x1] %vm59_vm6, %v482_v60 }
  0x5d   :  { %378 = vrcp.f32 %v148_v53 }
  0x60   :  { %v365_v9 = vpop.eup %364 }
  0x61   :  { %v367_v11 = vpop.eup %366  ;;  %v210_v13 = vmul.f32 0.6931472, %v365_v9 }
  0x62   :  { %v369_v15 = vpop.eup %368  ;;  %v214_v17 = vmul.f32 0.6931472, %v367_v11 }
  0x63   :  { %v371_v19 = vpop.eup %370  ;;  %v212_v20 = vmul.f32 0.6931472, %v369_v15  ;;  %v217_v21 = vsub.f32 %v210_v13, %v187_v6  ;;  %v273_v11 = vld [vmem:[#allocation7] sm:$0x1]  ;;  %v295_v14 = vld [vmem:[#allocation8] sm:$0x1] }
  0x64   :  { %v373_v23 = vpop.eup %372  ;;  %v216_v24 = vmul.f32 0.6931472, %v371_v19  ;;  %v219_v25 = vsub.f32 %v214_v17, %v201_v8 }
  0x65   :  { %v375_v27 = vpop.eup %374  ;;  %v218_v28 = vsub.f32 %v212_v20, %v194_v12  ;;  %v275_v29 = vsel %vm274_vm5, %v217_v21, 0.0  ;;  %v261_v31 = vmul.f32 %v373_v23, %v373_v23 }
  0x66   :  { %v377_v32 = vpop.eup %376  ;;  %v220_v33 = vsub.f32 %v216_v24, %v208_v16  ;;  %v262_v35 = vmul.f32 %v375_v27, %v375_v27  ;;  %v278_v38 = vsel %vm274_vm5, %v219_v25, 0.0 }
  0x67   :  { %v379_v36 = vpop.eup %378  ;;  %v276_v37 = vsel %vm274_vm5, %v218_v28, 0.0  ;;  %v263_v39 = vmul.f32 %v377_v32, %v377_v32  ;;  %v265_v40 = vmul.f32 %v261_v31, %v235_v22 }
  0x68   :  { %v277_v41 = vadd.f32 %v276_v37, %v275_v29  ;;  %v264_v42 = vmul.f32 %v379_v36, %v379_v36  ;;  %v266_v43 = vmul.f32 %v262_v35, %v242_v26  ;;  %v280_v44 = vsel %vm274_vm5, %v220_v33, 0.0 }
  0x69   :  { %v267_v45 = vmul.f32 %v263_v39, %v249_v30  ;;  %v269_v46 = vadd.f32 2.0, %v265_v40 }
  0x6a   :  { %v279_v47 = vadd.f32 %v278_v38, %v277_v41  ;;  %v268_v48 = vmul.f32 %v264_v42, %v256_v34  ;;  %v270_v49 = vadd.f32 2.0, %v266_v43 }
  0x6b   :  { %v271_v50 = vadd.f32 2.0, %v267_v45  ;;  %v296_v51 = vsel %vm274_vm5, %v269_v46, 0.0 }
  0x6c   :  { %v281_v52 = vadd.f32 %v280_v44, %v279_v47  ;;  %v272_v53 = vadd.f32 2.0, %v268_v48  ;;  %v297_v54 = vsel %vm274_vm5, %v270_v49, 0.0 }
  0x6d   :  { %v298_v55 = vadd.f32 %v297_v54, %v296_v51  ;;  %v299_v56 = vsel %vm274_vm5, %v271_v50, 0.0 }
  0x6e   :  { %282 = vadd.xlane.f32.xlu0 %v281_v52  ;;  %v301_v57 = vsel %vm274_vm5, %v272_v53, 0.0 }
  0x6f   :  { %v300_v58 = vadd.f32 %v299_v56, %v298_v55 }
  0x71   :  { %v302_v59 = vadd.f32 %v301_v57, %v300_v58 }
  0x73   :  { %303 = vadd.xlane.f32.xlu0 %v302_v59 }
  0xfb   :  { %v283_v61 = vpop.xlane.xlu0 %282 }
  0xfc   :  { %v284_v62 = vrot.slane %v283_v61, 4 }
  0xfe   :  { %v285_v63 = vadd.f32 %v284_v62, %v283_v61 }
 0x100   :  { %v286_v0 = vrot.slane %v285_v63, 2  ;;  %v304_v2 = vpop.xlane.xlu0 %303 }
 0x101   :  { %v305_v3 = vrot.slane %v304_v2, 4 }
 0x102   :  { %v287_v4 = vadd.f32 %v286_v0, %v285_v63 }
 0x103   :  { %v306_v1 = vadd.f32 %v305_v3, %v304_v2 }
 0x104   :  { %v288_v5 = vrot.slane %v287_v4, 1 }
 0x105   :  { %v307_v6 = vrot.slane %v306_v1, 2 }
 0x106   :  { %v289_v7 = vadd.f32 %v288_v5, %v287_v4 }
 0x107   :  { %v308_v9 = vadd.f32 %v307_v6, %v306_v1 }
 0x108   :  { %345 = vpush %v289_v7 }
 0x109   :  { %v309_v8 = vrot.slane %v308_v9, 1 }
 0x10b   :  { %v310_v10 = vadd.f32 %v309_v8, %v308_v9 }
 0x10d   :  { %347 = vpush %v310_v10 }
 0x139   :  { %s346_s1 = spop %345 }
 0x13a   :  { %v291_v12 = vstv %s346_s1 }
 0x13b   :  { %v292_v13 = vadd.f32 %v291_v12, %v273_v11 }
 0x13d   :  { %294 = vst.msk [vmem:[#allocation7] sm:$0x1] %vm59_vm6, %v292_v13 }
 0x13e   :  { %s348_s16 = spop %347 }
 0x13f   :  { %v312_v15 = vstv %s348_s16 }
 0x140   :  { %435 = shalt.err (!%p432_p6)
}
 0x141   :  { %s436_s21 = scalar_lea.hbm %s583_s2, 16 }
 0x142   :  { %p437_p7 = scmp.ne.s32.totalorder %s583_s2, %s436_s21  ;;  %p440_p8 = scmp.lt.u32.totalorder %s436_s21, %s583_s2 }
 0x144   :  { %p442_p9 = pnand %p440_p8, %p437_p7 }
 0x146   :  { %445 = shalt.err (!%p442_p9)
}
 0x147   :  { %324 = dma.vmem_to_hbm [thread:$0]  %s322_s13, 16, %s583_s2, [#allocation4]   ;;  %v313_v16 = vadd.f32 %v312_v15, %v295_v14 }
 0x148   :  { %s446_s28 = scalar_lea.vmem %s332_s15, 16  ;;  %s450_s29 = scalar_lea.vmem %s332_s15, 32 }
 0x149   :  { %314 = vst.msk [vmem:[#allocation8] sm:$0x1] %vm59_vm6, %v313_v16  ;;  %p447_p10 = scmp.ne.s32.totalorder %s332_s15, %s446_s28  ;;  %p451_p11 = scmp.lt.s32.totalorder %s332_s15, %s332_s15 }
 0x14a   :  { %p452_p12 = scmp.lt.s32.totalorder %s450_s29, %s446_s28 }
 0x14c   :  { %p453_p13 = por %p452_p12, %p451_p11 }
 0x14e   :  { %p454_p0 = pnand %p453_p13, %p447_p10 }
 0x150   :  { %457 = shalt.err (!%p454_p0)
}
 0x151   :  { %s458_s5 = scalar_lea.hbm %s584_s3, 16 }
 0x152   :  { %p459_p1 = scmp.ne.s32.totalorder %s584_s3, %s458_s5  ;;  %p462_p2 = scmp.lt.u32.totalorder %s458_s5, %s584_s3 }
 0x154   :  { %p464_p3 = pnand %p462_p2, %p459_p1 }
 0x156   :  { %467 = shalt.err (!%p464_p3)
}
 0x157   :  { %334 = dma.vmem_to_hbm [thread:$0]  %s332_s15, 16, %s584_s3, [#allocation9]  }
 0x158   :  { %472 = dma.done.wait [#allocation4], 16  }
 0x159   :  { %473 = vsyncadd [#allocation4], 4294967280 }
 0x15a   :  { %474 = dma.done.wait [#allocation9], 16  }
 0x15b   :  { %475 = vsyncadd [#allocation9], 4294967280 }
 0x15c   :  { %341 = vsyncpa [#allocation3], 1 }
 0x15d   :  { %342 = vsyncpa [#allocation6], 1 }
 0x15e   :  { %343 = vsyncpa [#allocation4], 1 }
 0x15f   :  { %344 = vsyncpa [#allocation9], 1 }

</bundles_post_ra>
